<compile_context>
chip_gen: v5e
topology: v5e:2x2
jax: 0.10.0
libtpu: 0.0.40
codegen_flags: <defaults>
</compile_context>

<pallas_src>
import functools
import math

import jax
import jax.numpy as jnp
from jax.experimental import pallas as pl
from jax.experimental.pallas import tpu as pltpu


def _round_up(x, m):
    return ((x + m - 1) // m) * m


def _cvae_kernel(
    x_ref, t_ref, eps_ref,
    w1_ref, b1_ref,                 # (n_in, n_hid), (1, n_hid)
    w2_ref, b2_ref,                 # fused [fc21 | fc22]: (n_hid, 2*z_dim), (1, 2*z_dim)
    w3z_ref, w3t_ref, b3_ref,       # (z_dim, n_hid), (t_dim, n_hid), (1, n_hid)
    w4_ref, b4_ref,                 # (n_hid, n_in), (1, n_in)
    out_ref,                        # (tb, slab_wp) packed [x_recon | mu | logvar | z | pad]
    *, z_dim, pad_lanes,
):
    f32 = jnp.float32

    x = x_ref[...]
    t = t_ref[...]

    # ---- encode: h1 = relu(fc1(x)); [mu | logvar] = h1 @ [W21 | W22] + b ----
    h1 = jnp.dot(x.astype(w1_ref.dtype), w1_ref[...],
                 preferred_element_type=f32) + b1_ref[...]
    h1 = jnp.maximum(h1, 0.0)

    ml = jnp.dot(h1.astype(w2_ref.dtype), w2_ref[...],
                 preferred_element_type=f32) + b2_ref[...]
    mu = ml[:, :z_dim]
    logvar = ml[:, z_dim:]

    # ---- reparameterize: z = mu + eps * exp(0.5 * logvar)  (f32 VPU/EUP) ----
    z = mu + eps_ref[...] * jnp.exp(0.5 * logvar)

    # ---- fc3 as two split-K dots (no in-kernel lane concat of (z, target)) ----
    h3 = (jnp.dot(z.astype(w3z_ref.dtype), w3z_ref[...], preferred_element_type=f32)
          + jnp.dot(t.astype(w3t_ref.dtype), w3t_ref[...], preferred_element_type=f32)
          + b3_ref[...])
    h3 = jnp.maximum(h3, 0.0)

    # ---- decode head: sigmoid via a single EUP tanh ----
    logits = jnp.dot(h3.astype(w4_ref.dtype), w4_ref[...],
                     preferred_element_type=f32) + b4_ref[...]
    xrec = 0.5 * (jnp.tanh(0.5 * logits) + 1.0)

    # ---- single lane-dense store of the packed output slab ----
    parts = [xrec, ml, z]
    if pad_lanes:
        parts.append(jnp.zeros((xrec.shape[0], pad_lanes), f32))
    out_ref[...] = jnp.concatenate(parts, axis=-1)


def prepare_params(torch_params, matmul_dtype=jnp.float32, w2_dtype=None):
    """One-time conversion of PyTorch-convention Linear params (weight (out,in))
    into kernel-ready layout: weights transposed to (in, out), fc21/fc22 fused,
    fc3 split along K into (z, target) halves, biases as (1, out) rows.

    matmul_dtype=jnp.bfloat16 is valid on v5e as well as v6e/v7x (the MXU is
    bf16-native on all three; only elementwise math needs f32, and it stays
    f32 in the kernel).  w2 (fc21/fc22) stays f32 by default because logvar
    error is amplified by exp(0.5*logvar); pass w2_dtype=bf16 to override."""
    md = matmul_dtype
    f32 = jnp.float32
    w2d = w2_dtype if w2_dtype is not None else f32
    z_dim = torch_params["fc21_w"].shape[0]
    w3 = torch_params["fc3_w"].T  # (z_dim + t_dim, n_hid)
    return {
        "w1": torch_params["fc1_w"].T.astype(md),                       # (n_in, n_hid)
        "b1": torch_params["fc1_b"].reshape(1, -1).astype(f32),
        "w2": jnp.concatenate(
            [torch_params["fc21_w"].T, torch_params["fc22_w"].T], axis=1
        ).astype(w2d),                                                  # (n_hid, 2*z_dim)
        "b2": jnp.concatenate(
            [torch_params["fc21_b"], torch_params["fc22_b"]]
        ).reshape(1, -1).astype(f32),
        "w3z": w3[:z_dim].astype(md),                                   # (z_dim, n_hid)
        "w3t": w3[z_dim:].astype(md),                                   # (t_dim, n_hid)
        "b3": torch_params["fc3_b"].reshape(1, -1).astype(f32),
        "w4": torch_params["fc4_w"].T.astype(md),                       # (n_hid, n_in)
        "b4": torch_params["fc4_b"].reshape(1, -1).astype(f32),
    }


def cvae_forward(kp, x, target, eps, *, tile_b=1024):
    """CVAE forward. kp = prepare_params(...). Returns (x_recon, mu, logvar, z_full).
    x / target may be bf16 (cast in-kernel); eps should stay f32."""
    B, n_in = x.shape
    t_dim = target.shape[1]
    z_dim = eps.shape[1]
    n_hid = kp["w1"].shape[1]
    assert kp["w2"].shape[1] == 2 * z_dim
    assert kp["w3z"].shape[0] == z_dim
    assert kp["w3t"].shape[0] == t_dim

    # Packed output slab: [x_recon | mu | logvar | z], lane-padded to 128.
    slab_w = n_in + 3 * z_dim
    slab_wp = _round_up(slab_w, 128)
    pad_lanes = slab_wp - slab_w

    # Batch tile: multiple of 8, no bigger than needed; no jnp.pad — Pallas
    # handles the partial last block of the cdiv grid.
    tb = max(8, min(tile_b, _round_up(B, 8)))
    tb = _round_up(tb, 8)

    def act_bytes(t):
        in_b = t * (n_in * x.dtype.itemsize
                    + t_dim * target.dtype.itemsize
                    + z_dim * eps.dtype.itemsize)
        out_b = t * slab_wp * 4
        return in_b + out_b

    weight_bytes = sum(int(a.size) * a.dtype.itemsize for a in kp.values())

    # Explicit VMEM budget: 2 pipeline buffers for activations + 2 copies of
    # every weight, with headroom under v7x's 64 MiB physical VMEM (the
    # tightest generation) and v5e's 16 MiB scoped default.
    VMEM_BUDGET = 40 << 20
    while tb > 8 and 2 * act_bytes(tb) + 2 * weight_bytes > VMEM_BUDGET:
        tb = max(8, ((tb // 2) + 7) // 8 * 8)
    vmem_need = 2 * act_bytes(tb) + 2 * weight_bytes
    vmem_limit = int(min(max(int(vmem_need * 1.5) + (4 << 20), 32 << 20), 56 << 20))

    grid = (pl.cdiv(B, tb),)

    def batch_spec(feat):
        return pl.BlockSpec((tb, feat), lambda i: (i, 0))

    def const_spec(arr):
        return pl.BlockSpec(arr.shape, lambda i: (0, 0))

    in_specs = [
        batch_spec(n_in), batch_spec(t_dim), batch_spec(z_dim),
        const_spec(kp["w1"]), const_spec(kp["b1"]),
        const_spec(kp["w2"]), const_spec(kp["b2"]),
        const_spec(kp["w3z"]), const_spec(kp["w3t"]), const_spec(kp["b3"]),
        const_spec(kp["w4"]), const_spec(kp["b4"]),
    ]
    out_specs = pl.BlockSpec((tb, slab_wp), lambda i: (i, 0))
    out_shape = jax.ShapeDtypeStruct((B, slab_wp), jnp.float32)

    flops = 2 * B * (n_in * n_hid + n_hid * 2 * z_dim
                     + (z_dim + t_dim) * n_hid + n_hid * n_in)
    transcendentals = B * (z_dim + n_in)
    bytes_accessed = (
        B * (n_in * x.dtype.itemsize + t_dim * target.dtype.itemsize
             + z_dim * eps.dtype.itemsize)
        + B * slab_wp * 4
        + weight_bytes
    )

    kernel = functools.partial(_cvae_kernel, z_dim=z_dim, pad_lanes=pad_lanes)
    slab = pl.pallas_call(
        kernel,
        grid=grid,
        in_specs=in_specs,
        out_specs=out_specs,
        out_shape=out_shape,
        compiler_params=pltpu.CompilerParams(
            dimension_semantics=("parallel",),   # megacore sharding on v7x
            vmem_limit_bytes=vmem_limit,
        ),
        cost_estimate=pl.CostEstimate(
            flops=flops, transcendentals=transcendentals,
            bytes_accessed=bytes_accessed,
        ),
    )(
        x, target, eps,
        kp["w1"], kp["b1"], kp["w2"], kp["b2"],
        kp["w3z"], kp["w3t"], kp["b3"], kp["w4"], kp["b4"],
    )

    x_recon = slab[:, :n_in]
    mu = slab[:, n_in:n_in + z_dim]
    logvar = slab[:, n_in + z_dim:n_in + 2 * z_dim]
    z = slab[:, n_in + 2 * z_dim:n_in + 3 * z_dim]
    # z_full = hstack(z, target): its right half is a verbatim input copy, so
    # it is rebuilt here rather than written back out through HBM.
    z_full = jnp.concatenate([z, target.astype(z.dtype)], axis=1)
    return x_recon, mu, logvar, z_full


def init_params(key, n_in, n_hid, z_dim, z_dim2):
    """Deterministic PyTorch-style init: U(-1/sqrt(fan_in), 1/sqrt(fan_in))."""
    def linear(k, out_f, in_f):
        kw, kb = jax.random.split(k)
        bound = 1.0 / math.sqrt(in_f)
        w = jax.random.uniform(kw, (out_f, in_f), jnp.float32, -bound, bound)
        b = jax.random.uniform(kb, (out_f,), jnp.float32, -bound, bound)
        return w, b

    keys = jax.random.split(key, 5)
    p = {}
    p["fc1_w"], p["fc1_b"] = linear(keys[0], n_hid, n_in)
    p["fc21_w"], p["fc21_b"] = linear(keys[1], z_dim, n_hid)
    p["fc22_w"], p["fc22_b"] = linear(keys[2], z_dim, n_hid)
    p["fc3_w"], p["fc3_b"] = linear(keys[3], n_hid, z_dim2)
    p["fc4_w"], p["fc4_b"] = linear(keys[4], n_in, n_hid)
    return p


def _reference_forward(params, x, target, eps):
    """Pure-JAX reference mirroring the PyTorch module, for verification."""
    h1 = jnp.maximum(x @ params["fc1_w"].T + params["fc1_b"], 0.0)
    mu = h1 @ params["fc21_w"].T + params["fc21_b"]
    logvar = h1 @ params["fc22_w"].T + params["fc22_b"]
    z = mu + eps * jnp.exp(0.5 * logvar)
    z_full = jnp.concatenate([z, target], axis=1)
    h3 = jnp.maximum(z_full @ params["fc3_w"].T + params["fc3_b"], 0.0)
    x_recon = jax.nn.sigmoid(h3 @ params["fc4_w"].T + params["fc4_b"])
    return x_recon, mu, logvar, z_full


if __name__ == "__main__":
    # Small shapes consistent with the module; z_dim2 = z_dim + t_dim so that
    # hstack(z, target) -> fc3 typechecks.
    B, n_in, n_hid, z_dim, t_dim = 8, 32, 32, 16, 16
    z_dim2 = z_dim + t_dim

    root = jax.random.PRNGKey(0)
    k_param, k_x, k_t, k_eps = jax.random.split(root, 4)

    params = init_params(k_param, n_in, n_hid, z_dim, z_dim2)
    x = jax.random.normal(k_x, (B, n_in), jnp.float32)
    target = jax.random.normal(k_t, (B, t_dim), jnp.float32)
    # eps ~ Normal(0,1): sampled outside the kernel so semantics match
    # torch.randn_like deterministically for this test.
    eps = jax.random.normal(k_eps, (B, z_dim), jnp.float32)

    # f32 matmuls here for tight parity with the reference; on any generation
    # (v5e included — its MXU is bf16-native) use
    # prepare_params(params, matmul_dtype=jnp.bfloat16) for full-rate MXU and
    # halved weight traffic; w2 stays f32 by default to protect logvar.
    kp = prepare_params(params)
    fwd = jax.jit(functools.partial(cvae_forward, kp))
    x_recon, mu, logvar, z_full = fwd(x, target, eps)
    jax.block_until_ready((x_recon, mu, logvar, z_full))

    # Cross-check against the pure-JAX reference.
    r_xrec, r_mu, r_logvar, r_z = _reference_forward(params, x, target, eps)
    assert jnp.allclose(mu, r_mu, atol=1e-5, rtol=1e-5)
    assert jnp.allclose(logvar, r_logvar, atol=1e-5, rtol=1e-5)
    assert jnp.allclose(z_full, r_z, atol=1e-5, rtol=1e-5)
    # sigmoid via EUP tanh: exact formulation, tiny transcendental rounding.
    assert jnp.allclose(x_recon, r_xrec, atol=2e-4, rtol=0)

    print("KERNEL_OK")
</pallas_src>

<mosaic_0001>
module attributes {stable_mosaic.version = 11 : i64} {
  func.func @_cvae_kernel(%arg0: i32, %arg1: memref<8x32xf32, #tpu.memory_space<vmem>>, %arg2: memref<8x16xf32, #tpu.memory_space<vmem>>, %arg3: memref<8x16xf32, #tpu.memory_space<vmem>>, %arg4: memref<32x32xf32, #tpu.memory_space<vmem>>, %arg5: memref<1x32xf32, #tpu.memory_space<vmem>>, %arg6: memref<32x32xf32, #tpu.memory_space<vmem>>, %arg7: memref<1x32xf32, #tpu.memory_space<vmem>>, %arg8: memref<16x32xf32, #tpu.memory_space<vmem>>, %arg9: memref<16x32xf32, #tpu.memory_space<vmem>>, %arg10: memref<1x32xf32, #tpu.memory_space<vmem>>, %arg11: memref<32x32xf32, #tpu.memory_space<vmem>>, %arg12: memref<1x32xf32, #tpu.memory_space<vmem>>, %arg13: memref<8x128xf32, #tpu.memory_space<vmem>>) attributes {dimension_semantics = [#tpu.dimension_semantics<parallel>], iteration_bounds = array<i64: 1>, scalar_prefetch = 0 : i64, scratch_operands = 0 : i64, tpu.core_type = #tpu.core_type<tc>, window_params = [{transform_indices = @transform_0, window_bounds = array<i64: 8, 32>}, {transform_indices = @transform_1, window_bounds = array<i64: 8, 16>}, {transform_indices = @transform_2, window_bounds = array<i64: 8, 16>}, {pipeline_mode = #tpu.pipeline_mode<synchronous>, transform_indices = @transform_3, window_bounds = array<i64: 32, 32>}, {pipeline_mode = #tpu.pipeline_mode<synchronous>, transform_indices = @transform_4, window_bounds = array<i64: 1, 32>}, {pipeline_mode = #tpu.pipeline_mode<synchronous>, transform_indices = @transform_5, window_bounds = array<i64: 32, 32>}, {pipeline_mode = #tpu.pipeline_mode<synchronous>, transform_indices = @transform_6, window_bounds = array<i64: 1, 32>}, {pipeline_mode = #tpu.pipeline_mode<synchronous>, transform_indices = @transform_7, window_bounds = array<i64: 16, 32>}, {pipeline_mode = #tpu.pipeline_mode<synchronous>, transform_indices = @transform_8, window_bounds = array<i64: 16, 32>}, {pipeline_mode = #tpu.pipeline_mode<synchronous>, transform_indices = @transform_9, window_bounds = array<i64: 1, 32>}, {pipeline_mode = #tpu.pipeline_mode<synchronous>, transform_indices = @transform_10, window_bounds = array<i64: 32, 32>}, {pipeline_mode = #tpu.pipeline_mode<synchronous>, transform_indices = @transform_11, window_bounds = array<i64: 1, 32>}, {transform_indices = @transform_12, window_bounds = array<i64: 8, 128>}]} {
    %c0 = arith.constant 0 : index
    %c0_0 = arith.constant 0 : index
    %0 = vector.load %arg1[%c0, %c0_0] : memref<8x32xf32, #tpu.memory_space<vmem>>, vector<8x32xf32>
    %c0_1 = arith.constant 0 : index
    %c0_2 = arith.constant 0 : index
    %1 = vector.load %arg2[%c0_1, %c0_2] : memref<8x16xf32, #tpu.memory_space<vmem>>, vector<8x16xf32>
    %c0_3 = arith.constant 0 : index
    %c0_4 = arith.constant 0 : index
    %2 = vector.load %arg4[%c0_3, %c0_4] : memref<32x32xf32, #tpu.memory_space<vmem>>, vector<32x32xf32>
    %cst = arith.constant dense<0.000000e+00> : vector<8x32xf32>
    %3 = tpu.matmul %0, %2, %cst {dimension_numbers = #tpu.dot_dimension_numbers<[1], [0], [0], [1], [0, 0, 1, 1], [], []>} : vector<8x32xf32>, vector<32x32xf32>, vector<8x32xf32> -> vector<8x32xf32>
    %c0_5 = arith.constant 0 : index
    %c0_6 = arith.constant 0 : index
    %4 = vector.load %arg5[%c0_5, %c0_6] : memref<1x32xf32, #tpu.memory_space<vmem>>, vector<1x32xf32>
    %5 = vector.broadcast %4 : vector<1x32xf32> to vector<8x32xf32>
    %6 = arith.addf %3, %5 : vector<8x32xf32>
    %cst_7 = arith.constant 0.000000e+00 : f32
    %7 = vector.broadcast %cst_7 : f32 to vector<8x32xf32>
    %8 = arith.maximumf %6, %7 : vector<8x32xf32>
    %c0_8 = arith.constant 0 : index
    %c0_9 = arith.constant 0 : index
    %9 = vector.load %arg6[%c0_8, %c0_9] : memref<32x32xf32, #tpu.memory_space<vmem>>, vector<32x32xf32>
    %cst_10 = arith.constant dense<0.000000e+00> : vector<8x32xf32>
    %10 = tpu.matmul %8, %9, %cst_10 {dimension_numbers = #tpu.dot_dimension_numbers<[1], [0], [0], [1], [0, 0, 1, 1], [], []>} : vector<8x32xf32>, vector<32x32xf32>, vector<8x32xf32> -> vector<8x32xf32>
    %c0_11 = arith.constant 0 : index
    %c0_12 = arith.constant 0 : index
    %11 = vector.load %arg7[%c0_11, %c0_12] : memref<1x32xf32, #tpu.memory_space<vmem>>, vector<1x32xf32>
    %12 = vector.broadcast %11 : vector<1x32xf32> to vector<8x32xf32>
    %13 = arith.addf %10, %12 : vector<8x32xf32>
    %14 = vector.extract_strided_slice %13 {offsets = [0, 0], sizes = [8, 16], strides = [1, 1]} : vector<8x32xf32> to vector<8x16xf32>
    %15 = vector.extract_strided_slice %13 {offsets = [0, 16], sizes = [8, 16], strides = [1, 1]} : vector<8x32xf32> to vector<8x16xf32>
    %c0_13 = arith.constant 0 : index
    %c0_14 = arith.constant 0 : index
    %16 = vector.load %arg3[%c0_13, %c0_14] : memref<8x16xf32, #tpu.memory_space<vmem>>, vector<8x16xf32>
    %cst_15 = arith.constant 5.000000e-01 : f32
    %17 = vector.broadcast %cst_15 : f32 to vector<8x16xf32>
    %18 = arith.mulf %17, %15 : vector<8x16xf32>
    %19 = math.exp %18 : vector<8x16xf32>
    %20 = arith.mulf %16, %19 : vector<8x16xf32>
    %21 = arith.addf %14, %20 : vector<8x16xf32>
    %c0_16 = arith.constant 0 : index
    %c0_17 = arith.constant 0 : index
    %22 = vector.load %arg8[%c0_16, %c0_17] : memref<16x32xf32, #tpu.memory_space<vmem>>, vector<16x32xf32>
    %cst_18 = arith.constant dense<0.000000e+00> : vector<8x32xf32>
    %23 = tpu.matmul %21, %22, %cst_18 {dimension_numbers = #tpu.dot_dimension_numbers<[1], [0], [0], [1], [0, 0, 1, 1], [], []>} : vector<8x16xf32>, vector<16x32xf32>, vector<8x32xf32> -> vector<8x32xf32>
    %c0_19 = arith.constant 0 : index
    %c0_20 = arith.constant 0 : index
    %24 = vector.load %arg9[%c0_19, %c0_20] : memref<16x32xf32, #tpu.memory_space<vmem>>, vector<16x32xf32>
    %cst_21 = arith.constant dense<0.000000e+00> : vector<8x32xf32>
    %25 = tpu.matmul %1, %24, %cst_21 {dimension_numbers = #tpu.dot_dimension_numbers<[1], [0], [0], [1], [0, 0, 1, 1], [], []>} : vector<8x16xf32>, vector<16x32xf32>, vector<8x32xf32> -> vector<8x32xf32>
    %26 = arith.addf %23, %25 : vector<8x32xf32>
    %c0_22 = arith.constant 0 : index
    %c0_23 = arith.constant 0 : index
    %27 = vector.load %arg10[%c0_22, %c0_23] : memref<1x32xf32, #tpu.memory_space<vmem>>, vector<1x32xf32>
    %28 = vector.broadcast %27 : vector<1x32xf32> to vector<8x32xf32>
    %29 = arith.addf %26, %28 : vector<8x32xf32>
    %cst_24 = arith.constant 0.000000e+00 : f32
    %30 = vector.broadcast %cst_24 : f32 to vector<8x32xf32>
    %31 = arith.maximumf %29, %30 : vector<8x32xf32>
    %c0_25 = arith.constant 0 : index
    %c0_26 = arith.constant 0 : index
    %32 = vector.load %arg11[%c0_25, %c0_26] : memref<32x32xf32, #tpu.memory_space<vmem>>, vector<32x32xf32>
    %cst_27 = arith.constant dense<0.000000e+00> : vector<8x32xf32>
    %33 = tpu.matmul %31, %32, %cst_27 {dimension_numbers = #tpu.dot_dimension_numbers<[1], [0], [0], [1], [0, 0, 1, 1], [], []>} : vector<8x32xf32>, vector<32x32xf32>, vector<8x32xf32> -> vector<8x32xf32>
    %c0_28 = arith.constant 0 : index
    %c0_29 = arith.constant 0 : index
    %34 = vector.load %arg12[%c0_28, %c0_29] : memref<1x32xf32, #tpu.memory_space<vmem>>, vector<1x32xf32>
    %35 = vector.broadcast %34 : vector<1x32xf32> to vector<8x32xf32>
    %36 = arith.addf %33, %35 : vector<8x32xf32>
    %cst_30 = arith.constant 5.000000e-01 : f32
    %37 = vector.broadcast %cst_30 : f32 to vector<8x32xf32>
    %38 = arith.mulf %37, %36 : vector<8x32xf32>
    %39 = math.tanh %38 : vector<8x32xf32>
    %cst_31 = arith.constant 1.000000e+00 : f32
    %40 = vector.broadcast %cst_31 : f32 to vector<8x32xf32>
    %41 = arith.addf %39, %40 : vector<8x32xf32>
    %cst_32 = arith.constant 5.000000e-01 : f32
    %42 = vector.broadcast %cst_32 : f32 to vector<8x32xf32>
    %43 = arith.mulf %42, %41 : vector<8x32xf32>
    %cst_33 = arith.constant 0.000000e+00 : f32
    %44 = vector.broadcast %cst_33 : f32 to vector<8x48xf32>
    %45 = tpu.concatenate %43, %13, %21, %44 in 1 : vector<8x32xf32>, vector<8x32xf32>, vector<8x16xf32>, vector<8x48xf32> -> vector<8x128xf32>
    %c0_34 = arith.constant 0 : index
    %c0_35 = arith.constant 0 : index
    %46 = vector.load %arg13[%c0_34, %c0_35] : memref<8x128xf32, #tpu.memory_space<vmem>>, vector<8x128xf32>
    tpu.vector_store %arg13[%c0_34, %c0_35], %45 {strides = array<i32>} : memref<8x128xf32, #tpu.memory_space<vmem>>, vector<8x128xf32>,
    return
  }
  func.func @transform_0(%arg0: i32) -> (i32, i32) {
    %c0_i32 = arith.constant 0 : i32
    %c0_i32_0 = arith.constant 0 : i32
    return %arg0, %c0_i32 : i32, i32
  }
  func.func @transform_1(%arg0: i32) -> (i32, i32) {
    %c0_i32 = arith.constant 0 : i32
    %c0_i32_0 = arith.constant 0 : i32
    return %arg0, %c0_i32 : i32, i32
  }
  func.func @transform_2(%arg0: i32) -> (i32, i32) {
    %c0_i32 = arith.constant 0 : i32
    %c0_i32_0 = arith.constant 0 : i32
    return %arg0, %c0_i32 : i32, i32
  }
  func.func @transform_3(%arg0: i32) -> (i32, i32) {
    %c0_i32 = arith.constant 0 : i32
    %c0_i32_0 = arith.constant 0 : i32
    %c0_i32_1 = arith.constant 0 : i32
    return %c0_i32, %c0_i32_0 : i32, i32
  }
  func.func @transform_4(%arg0: i32) -> (i32, i32) {
    %c0_i32 = arith.constant 0 : i32
    %c0_i32_0 = arith.constant 0 : i32
    %c0_i32_1 = arith.constant 0 : i32
    return %c0_i32, %c0_i32_0 : i32, i32
  }
  func.func @transform_5(%arg0: i32) -> (i32, i32) {
    %c0_i32 = arith.constant 0 : i32
    %c0_i32_0 = arith.constant 0 : i32
    %c0_i32_1 = arith.constant 0 : i32
    return %c0_i32, %c0_i32_0 : i32, i32
  }
  func.func @transform_6(%arg0: i32) -> (i32, i32) {
    %c0_i32 = arith.constant 0 : i32
    %c0_i32_0 = arith.constant 0 : i32
    %c0_i32_1 = arith.constant 0 : i32
    return %c0_i32, %c0_i32_0 : i32, i32
  }
  func.func @transform_7(%arg0: i32) -> (i32, i32) {
    %c0_i32 = arith.constant 0 : i32
    %c0_i32_0 = arith.constant 0 : i32
    %c0_i32_1 = arith.constant 0 : i32
    return %c0_i32, %c0_i32_0 : i32, i32
  }
  func.func @transform_8(%arg0: i32) -> (i32, i32) {
    %c0_i32 = arith.constant 0 : i32
    %c0_i32_0 = arith.constant 0 : i32
    %c0_i32_1 = arith.constant 0 : i32
    return %c0_i32, %c0_i32_0 : i32, i32
  }
  func.func @transform_9(%arg0: i32) -> (i32, i32) {
    %c0_i32 = arith.constant 0 : i32
    %c0_i32_0 = arith.constant 0 : i32
    %c0_i32_1 = arith.constant 0 : i32
    return %c0_i32, %c0_i32_0 : i32, i32
  }
  func.func @transform_10(%arg0: i32) -> (i32, i32) {
    %c0_i32 = arith.constant 0 : i32
    %c0_i32_0 = arith.constant 0 : i32
    %c0_i32_1 = arith.constant 0 : i32
    return %c0_i32, %c0_i32_0 : i32, i32
  }
  func.func @transform_11(%arg0: i32) -> (i32, i32) {
    %c0_i32 = arith.constant 0 : i32
    %c0_i32_0 = arith.constant 0 : i32
    %c0_i32_1 = arith.constant 0 : i32
    return %c0_i32, %c0_i32_0 : i32, i32
  }
  func.func @transform_12(%arg0: i32) -> (i32, i32) {
    %c0_i32 = arith.constant 0 : i32
    %c0_i32_0 = arith.constant 0 : i32
    return %arg0, %c0_i32 : i32, i32
  }
}

</mosaic_0001>

<bundles_post_ra>
// kernel: cvae_forward.1
= control target key start
LH: loop header
LB: loop body
LE: loop exit
PB: predicated region body
PF: predicated region fallthrough
CT: control target
= control target key end

     0   :  { %17 = vsyncpa [#allocation3], 0  ;;  %s753_s0 = inlined_call_operand.hbm [shape: f32[8,32], index: 0, kind: input, shape index: {}]   ;;  %s754_s1 = inlined_call_operand.hbm [shape: f32[8,16], index: 1, kind: input, shape index: {}]   ;;  %s755_s2 = inlined_call_operand.hbm [shape: f32[8,16], index: 2, kind: input, shape index: {}]   ;;  %s756_s3 = inlined_call_operand.hbm [shape: f32[32,32], index: 3, kind: input, shape index: {}]   ;;  %s757_s4 = inlined_call_operand.hbm [shape: f32[1,32], index: 4, kind: input, shape index: {}]   ;;  %s758_s5 = inlined_call_operand.hbm [shape: f32[32,32], index: 5, kind: input, shape index: {}]   ;;  %s759_s6 = inlined_call_operand.vmem [shape: f32[1,32], index: 6, kind: input, shape index: {}]   ;;  %s760_s7 = inlined_call_operand.hbm [shape: f32[16,32], index: 7, kind: input, shape index: {}]   ;;  %s761_s8 = inlined_call_operand.hbm [shape: f32[16,32], index: 8, kind: input, shape index: {}]   ;;  %s762_s9 = inlined_call_operand.vmem [shape: f32[1,32], index: 9, kind: input, shape index: {}]   ;;  %s763_s10 = inlined_call_operand.hbm [shape: f32[32,32], index: 10, kind: input, shape index: {}]   ;;  %s764_s11 = inlined_call_operand.vmem [shape: f32[1,32], index: 11, kind: input, shape index: {}]   ;;  %s765_s12 = inlined_call_operand.vmem [shape: f32[8,128], index: 12, kind: output, shape index: {}]  }
   0x1   :  { %18 = vsyncpa [#allocation5], 0 }
   0x2   :  { %19 = vsyncpa [#allocation8], 0 }
   0x3   :  { %20 = vsyncpa [#allocation11], 0  ;;  %s38_s23 = sshll.u32 %s754_s1, 4  ;;  %s39_s23 = int_to_ptr.hbm [resolvable:$true] %s38_s23 }
   0x4   :  { %21 = vsyncpa [#allocation14], 0  ;;  %s616_s24 = smov [#allocation4]   ;;  %s59_s28 = sshll.u32 %s756_s3, 4  ;;  %s60_s28 = int_to_ptr.hbm [resolvable:$true] %s59_s28 }
   0x5   :  { %s40_s25 = sshll.u32 %s616_s24, 4  ;;  %s617_s29 = smov [#allocation7]   ;;  %s41_s25 = int_to_ptr.vmem [resolvable:$true] %s40_s25 }
   0x6   :  { %43 = dma.hbm_to_vmem [thread:$0]  %s39_s23, 128, %s41_s25, [#allocation5]  }
   0x7   :  { %s61_s30 = sshll.u32 %s617_s29, 4  ;;  %s618_s13 = smov 128   ;;  %s62_s30 = int_to_ptr.vmem [resolvable:$true] %s61_s30 }
   0x8   :  { %s619_s14 = smov 8   ;;  %s83_s16 = sshll.u32 %s758_s5, 4  ;;  %s84_s16 = int_to_ptr.hbm [resolvable:$true] %s83_s16 }
   0x9   :  { %67 = dma.hbm_to_vmem [thread:$0]  %s60_s28, 512, %s62_s30, [#allocation8], %s618_s13, %s618_s13, %s619_s14  }
   0xa   :  { %s620_s17 = smov [#allocation10]   ;;  %s111_s20 = sshll.u32 %s761_s8, 4  ;;  %s112_s20 = int_to_ptr.hbm [resolvable:$true] %s111_s20 }
   0xb   :  { %s85_s18 = sshll.u32 %s620_s17, 4  ;;  %s621_s21 = smov [#allocation13]   ;;  %s86_s18 = int_to_ptr.vmem [resolvable:$true] %s85_s18 }
   0xc   :  { %91 = dma.hbm_to_vmem [thread:$0]  %s84_s16, 512, %s86_s18, [#allocation11], %s618_s13, %s618_s13, %s619_s14  }
   0xd   :  { %s113_s22 = sshll.u32 %s621_s21, 4  ;;  %s27_s25 = sshll.u32 %s753_s0, 4  ;;  %s114_s22 = int_to_ptr.vmem [resolvable:$true] %s113_s22  ;;  %s28_s25 = int_to_ptr.hbm [resolvable:$true] %s27_s25 }
   0xe   :  { %119 = dma.hbm_to_vmem [thread:$0]  %s112_s20, 256, %s114_s22, [#allocation14], %s618_s13, %s618_s13, %s619_s14  }
   0xf   :  { %s49_s8 = sshll.u32 %s755_s2, 4  ;;  %s622_s27 = smov [#allocation2]   ;;  %s50_s8 = int_to_ptr.hbm [resolvable:$true] %s49_s8 }
  0x10   :  { %s29_s28 = sshll.u32 %s622_s27, 4  ;;  %s623_s29 = smov [#allocation6]   ;;  %s30_s28 = int_to_ptr.vmem [resolvable:$true] %s29_s28 }
  0x11   :  { %32 = dma.hbm_to_vmem [thread:$0]  %s28_s25, 128, %s30_s28, [#allocation3]  }
  0x12   :  { %s51_s30 = sshll.u32 %s623_s29, 4  ;;  %s73_s0 = sshll.u32 %s757_s4, 4  ;;  %s52_s30 = int_to_ptr.vmem [resolvable:$true] %s51_s30  ;;  %s74_s0 = int_to_ptr.hbm [resolvable:$true] %s73_s0 }
  0x13   :  { %54 = dma.hbm_to_vmem [thread:$0]  %s50_s8, 128, %s52_s30, [#allocation5]  }
  0x14   :  { %s98_s18 = sshll.u32 %s760_s7, 4  ;;  %s624_s3 = smov [#allocation9]   ;;  %s99_s18 = int_to_ptr.hbm [resolvable:$true] %s98_s18 }
  0x15   :  { %s75_s2 = sshll.u32 %s624_s3, 4  ;;  %s625_s19 = smov [#allocation12]   ;;  %s76_s2 = int_to_ptr.vmem [resolvable:$true] %s75_s2 }
  0x16   :  { %78 = dma.hbm_to_vmem [thread:$0]  %s74_s0, 16, %s76_s2, [#allocation8]  }
  0x17   :  { %s100_s20 = sshll.u32 %s625_s19, 4  ;;  %s126_s23 = sshll.u32 %s763_s10, 4  ;;  %s101_s20 = int_to_ptr.vmem [resolvable:$true] %s100_s20  ;;  %s127_s23 = int_to_ptr.hbm [resolvable:$true] %s126_s23 }
  0x18   :  { %106 = dma.hbm_to_vmem [thread:$0]  %s99_s18, 256, %s101_s20, [#allocation11], %s618_s13, %s618_s13, %s619_s14  }
  0x19   :  { %s626_s4 = smov [#allocation15]  }
  0x1a   :  { %s128_s24 = sshll.u32 %s626_s4, 4  ;;  %s129_s24 = int_to_ptr.vmem [resolvable:$true] %s128_s24 }
  0x1b   :  { %134 = dma.hbm_to_vmem [thread:$0]  %s127_s23, 512, %s129_s24, [#allocation14], %s618_s13, %s618_s13, %s619_s14  }
  0x1c   :  { %606 = dma.done.wait [#allocation3], 128  }
  0x1d   :  { %607 = vsyncadd [#allocation3], 4294967168 }
  0x1e   :  { %608 = dma.done.wait [#allocation5], 256  }
  0x1f   :  { %609 = vsyncadd [#allocation5], 4294967040 }
  0x20   :  { %610 = dma.done.wait [#allocation8], 528  }
  0x21   :  { %611 = vsyncadd [#allocation8], 4294966768 }
  0x22   :  { %612 = dma.done.wait [#allocation11], 768  }
  0x23   :  { %613 = vsyncadd [#allocation11], 4294966528 }
  0x24   :  { %614 = dma.done.wait [#allocation14], 768  }
  0x25   :  { %615 = vsyncadd [#allocation14], 4294966528  ;;  %v178_v0 = vld [vmem:[#allocation7 + $0x18] sm:$0xff]  ;;  %v177_v1 = vld [vmem:[#allocation7 + $0x10] sm:$0xff]  ;;  %vm183_vm0 = vcmask 261120   ;;  %s627_s13 = smov 112  }
  0x26   :  { %199 = vmatpush.msra.mxu0 %v178_v0  ;;  %v211_v2 = vld [vmem:[#allocation10 + $0x18] sm:$0xff]  ;;  %v176_v3 = vld [vmem:[#allocation7 + $0x8] sm:$0xff]  ;;  %v210_v6 = vld [vmem:[#allocation10 + $0x10] sm:$0xff]  ;;  %s628_s14 = smov 32   ;;  %vm253_vm1 = vcmask 130048   ;;  %vm349_vm2 = vcmask 523264  }
  0x27   :  { %231 = vmatpush.msra.mxu1 %v211_v2  ;;  %v175_v4 = vld [vmem:[#allocation7] sm:$0xff]  ;;  %v173_v5 = vld [vmem:[#allocation2] sm:$0xff]  ;;  %v251_v21 = vld [vmem:[#allocation13] sm:$0xff]  ;;  %vm351_vm3 = vcmask 654336  }
  0x28   :  { %200 = vmatpush.msra.mxu0 %v177_v1  ;;  %v209_v7 = vld [vmem:[#allocation10 + $0x8] sm:$0xff]  ;;  %v208_v8 = vld [vmem:[#allocation10] sm:$0xff]  ;;  %v382_v9 = vld [vmem:[#allocation9] ss:$0 sm:$0xff] }
  0x29   :  { %232 = vmatpush.msra.mxu1 %v210_v6  ;;  %v383_v13 = vld [vmem:[%s759_s6] ss:$0 sm:$0xff]  ;;  %v252_v19 = vld [vmem:[#allocation13 + $0x8] sm:$0xff]  ;;  %v250_v20 = vld [vmem:[#allocation12 + $0x8] sm:$0xff]  ;;  %s629_s6 = smov 64  }
  0x2a   :  { %201 = vmatpush.msra.mxu0 %v176_v3  ;;  %271 = vmatpush.msra.mxu2 %v252_v19  ;;  %v249_v22 = vld [vmem:[#allocation12] sm:$0xff]  ;;  %v174_v23 = vld [vmem:[#allocation4] sm:$0xff]  ;;  %v239_v24 = vld [vmem:[#allocation6] sm:$0xff] }
  0x2b   :  { %233 = vmatpush.msra.mxu1 %v209_v7  ;;  %294 = vmatpush.msra.mxu3 %v250_v20  ;;  %v309_v28 = vld [vmem:[#allocation15 + $0x18] sm:$0xff]  ;;  %v308_v29 = vld [vmem:[#allocation15 + $0x10] sm:$0xff]  ;;  %v307_v30 = vld [vmem:[#allocation15 + $0x8] sm:$0xff] }
  0x2c   :  { %202 = vmatpush.msra.mxu0 %v175_v4  ;;  %272 = vmatpush.msra.mxu2 %v251_v21  ;;  %v306_v31 = vld [vmem:[#allocation15] sm:$0xff] }
  0x2d   :  { %363 = vmatmul.msk.f32.vlgmr.msra.gmra.mxu0 %vm183_vm0, %v173_v5  ;;  %234 = vmatpush.msra.mxu1 %v208_v8  ;;  %v384_v33 = vld [vmem:[%s762_s9] ss:$0 sm:$0xff] }
  0x2e   :  { %295 = vmatpush.msra.mxu3 %v249_v22  ;;  %365 = vmatmul.msk.f32.vlgmr.msra.gmra.mxu2 %vm253_vm1, %v174_v23  ;;  %v385_v38 = vld [vmem:[%s764_s11] ss:$0 sm:$0xff] }
  0x2f   :  { %329 = vmatpush.msrb.mxu2 %v309_v28 }
  0x31   :  { %330 = vmatpush.msrb.mxu2 %v308_v29 }
  0x33   :  { %331 = vmatpush.msrb.mxu2 %v307_v30 }
  0x35   :  { %332 = vmatpush.msrb.mxu2 %v306_v31 }
  0xaa   :  { %v204_v10 = vpop.f32.mrf.mxu0 }
  0xab   :  { %v205_v11 = vadd.f32 %v382_v9, %v204_v10 }
  0xad   :  { %v207_v12 = vmax.f32 %v205_v11, 0.0 }
  0xaf   :  { %364 = vmatmul.msk.f32.vlgmr.msra.gmra.mxu1 %vm183_vm0, %v207_v12 }
  0xb1   :  { %v274_v32 = vpop.f32.mrf.mxu2 }
 0x12c   :  { %v236_v14 = vpop.f32.mrf.mxu1 }
 0x12d   :  { %v237_v15 = vadd.f32 %v383_v13, %v236_v14 }
 0x12f   :  { %v240_v16 = vmul.f32 0.5, %v237_v15 }
 0x131   :  { %v241_v17 = vmul.f32 1.442695, %v240_v16 }
 0x133   :  { %386 = vpow2.f32 %v241_v17 }
 0x139   :  { %v387_v18 = vpop.eup %386 }
 0x13a   :  { %244 = vrot.lane.b32.xlu0 %v387_v18, %s627_s13 }
 0x142   :  { %342 = vrot.lane.b32.xlu0 %v237_v15, %s628_s14 }
 0x1ac   :  { %v245_v25 = vpop.permute.xlu0 %244 }
 0x1ad   :  { %v247_v26 = vmul.f32 %v245_v25, %v239_v24 }
 0x1af   :  { %v248_v27 = vadd.f32 %v247_v26, %v237_v15 }
 0x1b1   :  { %345 = vrot.lane.b32.xlu1 %v248_v27, %s629_s6  ;;  %366 = vmatmul.msk.f32.vlgmr.msra.gmra.mxu3 %vm253_vm1, %v248_v27 }
 0x1b4   :  { %v343_v45 = vpop.permute.xlu0 %342 }
 0x223   :  { %v346_v46 = vpop.permute.xlu1 %345 }
 0x234   :  { %v297_v34 = vpop.f32.mrf.mxu3 }
 0x235   :  { %v298_v35 = vadd.f32 %v297_v34, %v274_v32 }
 0x237   :  { %v304_v36 = vadd.f32 %v384_v33, %v298_v35 }
 0x239   :  { %v305_v37 = vmax.f32 %v304_v36, 0.0 }
 0x23b   :  { %367 = vmatmul.msk.f32.vlgmr.msrb.gmra.mxu2 %vm183_vm0, %v305_v37 }
 0x2be   :  { %v334_v39 = vpop.f32.mrf.mxu2 }
 0x2bf   :  { %v335_v40 = vadd.f32 %v385_v38, %v334_v39 }
 0x2c1   :  { %v337_v41 = vmul.f32 0.5, %v335_v40 }
 0x2c3   :  { %388 = vtanh.f32 %v337_v41 }
 0x2c9   :  { %v389_v42 = vpop.eup %388 }
 0x2ca   :  { %v339_v43 = vadd.f32 1.0, %v389_v42 }
 0x2cc   :  { %v340_v44 = vmul.f32 0.5, %v339_v43 }
 0x2ce   :  { %v348_v47 = vsel %vm183_vm0, %v340_v44, %v343_v45 }
 0x2cf   :  { %v350_v48 = vsel %vm349_vm2, %v348_v47, %v346_v46 }
 0x2d0   :  { %v352_v49 = vsel %vm351_vm3, %v350_v48, 0.0 }
 0x2d1   :  { %353 = vst [vmem:[%s765_s12] sm:$0xff] %v352_v49 }
 0x2d2   :  { %358 = vsyncpa [#allocation3], 1 }
 0x2d3   :  { %359 = vsyncpa [#allocation5], 1 }
 0x2d4   :  { %360 = vsyncpa [#allocation8], 1 }
 0x2d5   :  { %361 = vsyncpa [#allocation11], 1 }
 0x2d6   :  { %362 = vsyncpa [#allocation14], 1 }

</bundles_post_ra>
